<compile_context>
chip_gen: v7x
topology: tpu7x:2x2x1
jax: 0.10.0
libtpu: 0.0.40
codegen_flags: <defaults>
</compile_context>

<pallas_src>
import math
import functools

import jax
import jax.numpy as jnp
from jax.experimental import pallas as pl
from jax.experimental.pallas import tpu as pltpu

# Same value PyTorch uses: np.finfo(float32).min
NEG_INF = float(jnp.finfo(jnp.float32).min)

_HI = jax.lax.Precision.HIGHEST


def _round_up(x, m):
    return ((x + m - 1) // m) * m


def _sha_bahdanau_kernel(k2_ref, v_ref, qp_ref, m_ref, wk_ref, wo_ref,
                         cvec_ref, attw_ref):
    # Block shapes:
    #   k2_ref  : (BB*klen, kdim)  key, pre-flattened in the wrapper (2-D stream)
    #   v_ref   : (BB, klen, vdim)
    #   qp_ref  : (BB, 1, att)     query projection with b_q + b_k folded in
    #   m_ref   : (BB, 1, klen)    lane-dense mask
    #   wk_ref  : (kdim, att)      resident weight
    #   wo_ref  : (1, 1, att)      resident weight (row form of w_out)
    #   cvec_ref: (BB, 1, vdim)
    #   attw_ref: (BB, 1, klen)
    BB, klen, _ = v_ref.shape
    att = wk_ref.shape[-1]

    # Key projection: ONE big MXU matmul for the whole batch block, kept 2-D so
    # the large streamed operand never gets relaid out in VMEM.
    kp2 = jnp.dot(k2_ref[...], wk_ref[...],
                  preferred_element_type=jnp.float32)           # (BB*klen, att) f32

    # Go 3-D once (sublane split; klen is padded to a multiple of 8 by the
    # wrapper) for the per-batch query broadcast + tanh, all in f32.
    kp3 = kp2.reshape(BB, klen, att)
    temp = jnp.tanh(kp3 + qp_ref[...])                          # (BB, klen, att)

    # Bahdanau energy, emitted lane-dense over klen directly (flash-style
    # batched contraction -> no transpose). b_out is softmax-invariant: dropped.
    wo_b = jnp.broadcast_to(wo_ref[...], (BB, 1, att))
    e = jnp.einsum('bqa,bka->bqk', wo_b, temp,
                   preferred_element_type=jnp.float32)          # (BB, 1, klen)

    # masked_fill(mask == 0, neg_inf); padded key positions carry mask == 0.
    e = jnp.where(m_ref[...] == 0.0, jnp.float32(NEG_INF), e)

    # Softmax over klen (lane axis); reciprocal runs on the EUP slot.
    emax = jnp.max(e, axis=-1, keepdims=True)                   # (BB, 1, 1)
    p = jnp.exp(e - emax)                                       # (BB, 1, klen)
    denom = jnp.sum(p, axis=-1, keepdims=True)                  # (BB, 1, 1)
    attw = p * pl.reciprocal(denom, approx=True)                # (BB, 1, klen)

    attw_ref[...] = attw.astype(attw_ref.dtype)

    # Context vector: batched (1, klen) @ (klen, vdim), f32 accumulation.
    cvec = jnp.einsum('bqk,bkd->bqd', attw,
                      v_ref[...].astype(jnp.float32),
                      preferred_element_type=jnp.float32)       # (BB, 1, vdim)
    cvec_ref[...] = cvec.astype(cvec_ref.dtype)


def _pick_block_b(B, klen_p, kdim, vdim, att, stream_bytes,
                  max_block_b=256, target_block_bytes=8 * 1024 * 1024):
    """Pick the batch tile so the double-buffered streaming blocks plus f32
    intermediates stay around `target_block_bytes` (the kernel is HBM-bandwidth
    bound; big tiles amortize the ~0.35us/grid-step pipeline overhead)."""
    lane = lambda d: _round_up(max(int(d), 1), 128)
    per_b_stream = (klen_p * lane(kdim) * stream_bytes        # key block
                    + klen_p * lane(vdim) * stream_bytes      # value block
                    + 8 * lane(att) * 4                       # qp block (1-row pads to 8 sublanes)
                    + 8 * lane(klen_p) * 4                    # mask block
                    + 8 * lane(vdim) * 4                      # cvec out block
                    + 8 * lane(klen_p) * 4)                   # attw out block
    per_b = 2 * per_b_stream + 3 * klen_p * lane(att) * 4     # 2x buffering + f32 intermediates
    bb = max(1, target_block_bytes // per_b)
    bb = int(min(bb, max_block_b, B))
    if bb >= 8:
        bb = (bb // 8) * 8
    if B >= 16 and bb >= B:
        # keep >= 2 grid steps so the 'parallel' batch axis can shard across
        # both TensorCores on dual-TC chips (v7x)
        bb = -(-B // 2)
    return max(bb, 1)


def init_params(key_dim, query_dim, att_dim, seed=0):
    """Deterministic init mimicking nn.Linear (uniform +-1/sqrt(fan_in)).
    Weights are stored already transposed: (in_dim, out_dim)."""
    k0 = jax.random.PRNGKey(seed)
    ks = jax.random.split(k0, 6)

    def lin(kw, kb, fan_in, fan_out):
        bound = 1.0 / math.sqrt(fan_in)
        w = jax.random.uniform(kw, (fan_in, fan_out), jnp.float32, -bound, bound)
        b = jax.random.uniform(kb, (1, fan_out), jnp.float32, -bound, bound)
        return w, b

    wk, bk = lin(ks[0], ks[1], key_dim, att_dim)    # w_key
    wq, bq = lin(ks[2], ks[3], query_dim, att_dim)  # w_query
    wo, bo = lin(ks[4], ks[5], att_dim, 1)          # w_out
    return dict(wk=wk, bk=bk, wq=wq, bq=bq, wo=wo, bo=bo)


@functools.partial(jax.jit, static_argnames=("block_b", "stream_dtype"))
def single_head_attention(key, value, query, params, mask=None, *,
                          block_b=None, stream_dtype=jnp.float32):
    B, klen, kdim = key.shape
    _, qlen, _ = query.shape
    vdim = value.shape[-1]
    assert qlen == 1, "Bahdanau energy broadcast requires qlen == 1"
    att = params["wk"].shape[-1]
    f32 = jnp.float32

    # Hoisted query projection; fold both linear biases into it.
    # (b_out shifts every energy uniformly -> softmax-invariant -> dropped.)
    qp = jnp.einsum('bqd,da->bqa', query.astype(f32), params["wq"].astype(f32),
                    precision=_HI)
    qp = qp + params["bq"] + params["bk"]                       # (B, 1, att)

    # Mask kept in its natural lane-dense (B, 1, klen) layout.
    if mask is None:
        mask_f = jnp.ones((B, 1, klen), f32)
    else:
        if mask.ndim == 2:
            mask = mask[:, None, :]
        mask_f = (mask != 0).astype(f32)                        # (B, 1, klen)

    # Optional bf16 streaming of the two big inputs (and w_key); accumulation
    # and all transcendental / softmax math stay in f32.
    key_s = key.astype(stream_dtype)
    value_s = value.astype(stream_dtype)
    wk_s = params["wk"].astype(stream_dtype)
    wo_r = params["wo"].astype(f32).reshape(1, 1, att)

    # Pad klen to a sublane multiple (padded key positions are masked out).
    # Note: a *fully* masked real row yields uniform weights over the padded
    # length instead of klen; the reference never exercises that edge case.
    klen_p = _round_up(klen, 8)
    if klen_p != klen:
        dk = klen_p - klen
        key_s = jnp.pad(key_s, ((0, 0), (0, dk), (0, 0)))
        value_s = jnp.pad(value_s, ((0, 0), (0, dk), (0, 0)))
        mask_f = jnp.pad(mask_f, ((0, 0), (0, 0), (0, dk)))     # zeros -> masked out

    # Batch tiling sized from a VMEM budget.
    stream_bytes = jnp.dtype(stream_dtype).itemsize
    if block_b is None:
        BB = _pick_block_b(B, klen_p, kdim, vdim, att, stream_bytes)
    else:
        BB = max(1, int(min(block_b, B)))
    B_pad = _round_up(B, BB)
    if B_pad != B:
        db = B_pad - B
        key_s = jnp.pad(key_s, ((0, db), (0, 0), (0, 0)))
        value_s = jnp.pad(value_s, ((0, db), (0, 0), (0, 0)))
        qp = jnp.pad(qp, ((0, db), (0, 0), (0, 0)))
        mask_f = jnp.pad(mask_f, ((0, db), (0, 0), (0, 0)), constant_values=1.0)

    # Key streamed pre-flattened (free XLA reshape) so the kernel never
    # relayouts the big streamed tensor.
    key2d = key_s.reshape(B_pad * klen_p, kdim)

    grid = (B_pad // BB,)

    cvec, attw = pl.pallas_call(
        _sha_bahdanau_kernel,
        out_shape=(
            jax.ShapeDtypeStruct((B_pad, 1, vdim), f32),
            jax.ShapeDtypeStruct((B_pad, 1, klen_p), f32),
        ),
        grid_spec=pltpu.PrefetchScalarGridSpec(
            num_scalar_prefetch=0,
            grid=grid,
            in_specs=[
                pl.BlockSpec((BB * klen_p, kdim), lambda b: (b, 0)),     # key (2-D stream)
                pl.BlockSpec((BB, klen_p, vdim), lambda b: (b, 0, 0)),   # value
                pl.BlockSpec((BB, 1, att), lambda b: (b, 0, 0)),         # qp (hoisted)
                pl.BlockSpec((BB, 1, klen_p), lambda b: (b, 0, 0)),      # mask (lane-dense)
                pl.BlockSpec((kdim, att), lambda b: (0, 0)),             # wk (resident)
                pl.BlockSpec((1, 1, att), lambda b: (0, 0, 0)),          # wo (resident)
            ],
            out_specs=[
                pl.BlockSpec((BB, 1, vdim), lambda b: (b, 0, 0)),        # cvec
                pl.BlockSpec((BB, 1, klen_p), lambda b: (b, 0, 0)),      # attw
            ],
        ),
        compiler_params=pltpu.CompilerParams(
            dimension_semantics=("parallel",),
            # above v5e's 16 MiB default scoped VMEM, within v7x's 64 MiB physical
            vmem_limit_bytes=40 * 1024 * 1024,
        ),
    )(key2d, value_s, qp, mask_f, wk_s, wo_r)

    return cvec[:B], attw[:B, :, :klen]


def _reference(key, value, query, params, mask=None):
    """Pure-JAX reference mirroring the PyTorch forward (with all biases)."""
    kp = jnp.einsum('bkd,da->bka', key, params["wk"], precision=_HI) + params["bk"]
    qp = jnp.einsum('bqd,da->bqa', query, params["wq"], precision=_HI) + params["bq"]
    energy = jnp.einsum('bka,ao->bko', jnp.tanh(kp + qp), params["wo"],
                        precision=_HI) + params["bo"]           # (B, klen, 1)
    energy = jnp.transpose(energy, (0, 2, 1))                   # (B, 1, klen)
    if mask is not None:
        if mask.ndim == 2:
            mask = mask[:, None, :]
        energy = jnp.where(mask == 0, NEG_INF, energy)
    attw = jax.nn.softmax(energy, axis=-1)
    cvec = jnp.einsum('bqk,bkd->bqd', attw, value, precision=_HI)
    return cvec, attw


if __name__ == "__main__":
    B, klen, qlen = 2, 16, 1
    key_dim, query_dim, att_dim, value_dim = 64, 64, 64, 32

    rng = jax.random.PRNGKey(0)
    r1, r2, r3 = jax.random.split(rng, 3)
    key_in = jax.random.normal(r1, (B, klen, key_dim), jnp.float32)
    value_in = jax.random.normal(r2, (B, klen, value_dim), jnp.float32)
    query_in = jax.random.normal(r3, (B, qlen, query_dim), jnp.float32)

    # 2-D padding-style mask: last 4 key positions of batch 1 are masked out.
    mask = jnp.ones((B, klen), jnp.float32)
    mask = mask.at[1, klen - 4:].set(0.0)

    params = init_params(key_dim, query_dim, att_dim, seed=0)

    # ---- f32 streaming path ------------------------------------------------
    cvec, attw = single_head_attention(key_in, value_in, query_in, params, mask=mask)
    jax.block_until_ready((cvec, attw))

    cvec_ref, attw_ref = _reference(key_in, value_in, query_in, params, mask=mask)
    assert cvec.shape == (B, qlen, value_dim) and attw.shape == (B, qlen, klen)
    # tolerance absorbs MXU f32 pass-structure differences between Mosaic and XLA
    assert jnp.allclose(cvec, cvec_ref, rtol=5e-3, atol=5e-3)
    assert jnp.allclose(attw, attw_ref, rtol=5e-3, atol=5e-3)
    # masked key positions must receive (numerically) zero attention weight
    assert float(jnp.max(attw[1, :, klen - 4:])) < 1e-6

    # ---- bf16 streaming path (halved key/value/w_key HBM read traffic) ------
    cvec_b, attw_b = single_head_attention(key_in, value_in, query_in, params,
                                           mask=mask, stream_dtype=jnp.bfloat16)
    jax.block_until_ready((cvec_b, attw_b))

    key_r = key_in.astype(jnp.bfloat16).astype(jnp.float32)
    value_r = value_in.astype(jnp.bfloat16).astype(jnp.float32)
    params_r = dict(params)
    params_r["wk"] = params["wk"].astype(jnp.bfloat16).astype(jnp.float32)
    cvec_ref_b, attw_ref_b = _reference(key_r, value_r, query_in, params_r, mask=mask)
    assert jnp.allclose(cvec_b, cvec_ref_b, rtol=5e-3, atol=5e-3)
    assert jnp.allclose(attw_b, attw_ref_b, rtol=5e-3, atol=5e-3)

    print("KERNEL_OK")
</pallas_src>

<mosaic_0001>
module attributes {stable_mosaic.version = 11 : i64} {
  func.func @_sha_bahdanau_kernel(%arg0: i32, %arg1: memref<32x64xf32, #tpu.memory_space<vmem>>, %arg2: memref<2x16x32xf32, #tpu.memory_space<vmem>>, %arg3: memref<2x1x64xf32, #tpu.memory_space<vmem>>, %arg4: memref<2x1x16xf32, #tpu.memory_space<vmem>>, %arg5: memref<64x64xf32, #tpu.memory_space<vmem>>, %arg6: memref<1x1x64xf32, #tpu.memory_space<vmem>>, %arg7: memref<2x1x32xf32, #tpu.memory_space<vmem>>, %arg8: memref<2x1x16xf32, #tpu.memory_space<vmem>>) attributes {dimension_semantics = [#tpu.dimension_semantics<parallel>], iteration_bounds = array<i64: 1>, scalar_prefetch = 0 : i64, scratch_operands = 0 : i64, tpu.core_type = #tpu.core_type<tc>, window_params = [{transform_indices = @transform_0, window_bounds = array<i64: 32, 64>}, {transform_indices = @transform_1, window_bounds = array<i64: 2, 16, 32>}, {transform_indices = @transform_2, window_bounds = array<i64: 2, 1, 64>}, {transform_indices = @transform_3, window_bounds = array<i64: 2, 1, 16>}, {pipeline_mode = #tpu.pipeline_mode<synchronous>, transform_indices = @transform_4, window_bounds = array<i64: 64, 64>}, {pipeline_mode = #tpu.pipeline_mode<synchronous>, transform_indices = @transform_5, window_bounds = array<i64: 1, 1, 64>}, {transform_indices = @transform_6, window_bounds = array<i64: 2, 1, 32>}, {transform_indices = @transform_7, window_bounds = array<i64: 2, 1, 16>}]} {
    %c0 = arith.constant 0 : index
    %c0_0 = arith.constant 0 : index
    %0 = vector.load %arg1[%c0, %c0_0] : memref<32x64xf32, #tpu.memory_space<vmem>>, vector<32x64xf32>
    %c0_1 = arith.constant 0 : index
    %c0_2 = arith.constant 0 : index
    %1 = vector.load %arg5[%c0_1, %c0_2] : memref<64x64xf32, #tpu.memory_space<vmem>>, vector<64x64xf32>
    %cst = arith.constant dense<0.000000e+00> : vector<32x64xf32>
    %2 = tpu.matmul %0, %1, %cst {dimension_numbers = #tpu.dot_dimension_numbers<[1], [0], [0], [1], [0, 0, 1, 1], [], []>} : vector<32x64xf32>, vector<64x64xf32>, vector<32x64xf32> -> vector<32x64xf32>
    %3 = vector.shape_cast %2 : vector<32x64xf32> to vector<2x16x64xf32>
    %c0_3 = arith.constant 0 : index
    %c0_4 = arith.constant 0 : index
    %c0_5 = arith.constant 0 : index
    %4 = vector.load %arg3[%c0_3, %c0_4, %c0_5] : memref<2x1x64xf32, #tpu.memory_space<vmem>>, vector<2x1x64xf32>
    %5 = vector.broadcast %4 : vector<2x1x64xf32> to vector<2x16x64xf32>
    %6 = arith.addf %3, %5 : vector<2x16x64xf32>
    %7 = math.tanh %6 : vector<2x16x64xf32>
    %c0_6 = arith.constant 0 : index
    %c0_7 = arith.constant 0 : index
    %c0_8 = arith.constant 0 : index
    %8 = vector.load %arg6[%c0_6, %c0_7, %c0_8] : memref<1x1x64xf32, #tpu.memory_space<vmem>>, vector<1x1x64xf32>
    %9 = vector.shape_cast %8 : vector<1x1x64xf32> to vector<1x1x64xf32>
    %10 = vector.broadcast %9 : vector<1x1x64xf32> to vector<2x1x64xf32>
    "tpu.trace_start"() <{level = 10 : i32, message = "bqa,bka->bqk"}> : () -> ()
    %cst_9 = arith.constant dense<0.000000e+00> : vector<2x1x16xf32>
    %11 = tpu.matmul %10, %7, %cst_9 {dimension_numbers = #tpu.dot_dimension_numbers<[2], [2], [1], [1], [0, 0, 0, 1, 1, 1], [0], [0]>} : vector<2x1x64xf32>, vector<2x16x64xf32>, vector<2x1x16xf32> -> vector<2x1x16xf32>
    "tpu.trace_stop"() : () -> ()
    %c0_10 = arith.constant 0 : index
    %c0_11 = arith.constant 0 : index
    %c0_12 = arith.constant 0 : index
    %12 = vector.load %arg4[%c0_10, %c0_11, %c0_12] : memref<2x1x16xf32, #tpu.memory_space<vmem>>, vector<2x1x16xf32>
    %cst_13 = arith.constant 0.000000e+00 : f32
    %13 = vector.broadcast %cst_13 : f32 to vector<2x1x16xf32>
    %14 = arith.cmpf oeq, %12, %13 : vector<2x1x16xf32>
    %cst_14 = arith.constant -3.40282347E+38 : f32
    %15 = vector.broadcast %cst_14 : f32 to vector<2x1x16xf32>
    %16 = arith.select %14, %15, %11 : vector<2x1x16xi1>, vector<2x1x16xf32>
    %cst_15 = arith.constant dense<0xFF800000> : vector<2x1xf32>
    %17 = vector.multi_reduction <maximumf>, %16, %cst_15 [2] : vector<2x1x16xf32> to vector<2x1xf32>
    %18 = vector.shape_cast %17 : vector<2x1xf32> to vector<2x1x1xf32>
    %19 = vector.broadcast %18 : vector<2x1x1xf32> to vector<2x1x16xf32>
    %20 = arith.subf %16, %19 : vector<2x1x16xf32>
    %21 = math.exp %20 : vector<2x1x16xf32>
    %cst_16 = arith.constant dense<0.000000e+00> : vector<2x1xf32>
    %22 = vector.multi_reduction <add>, %21, %cst_16 [2] : vector<2x1x16xf32> to vector<2x1xf32>
    %23 = vector.shape_cast %22 : vector<2x1xf32> to vector<2x1x1xf32>
    %24 = tpu.reciprocal %23 {approx = true} : vector<2x1x1xf32> -> vector<2x1x1xf32>
    %25 = vector.broadcast %24 : vector<2x1x1xf32> to vector<2x1x16xf32>
    %26 = arith.mulf %21, %25 : vector<2x1x16xf32>
    %c0_17 = arith.constant 0 : index
    %c0_18 = arith.constant 0 : index
    %c0_19 = arith.constant 0 : index
    %27 = vector.load %arg8[%c0_17, %c0_18, %c0_19] : memref<2x1x16xf32, #tpu.memory_space<vmem>>, vector<2x1x16xf32>
    tpu.vector_store %arg8[%c0_17, %c0_18, %c0_19], %26 {strides = array<i32>} : memref<2x1x16xf32, #tpu.memory_space<vmem>>, vector<2x1x16xf32>,
    %c0_20 = arith.constant 0 : index
    %c0_21 = arith.constant 0 : index
    %c0_22 = arith.constant 0 : index
    %28 = vector.load %arg2[%c0_20, %c0_21, %c0_22] : memref<2x16x32xf32, #tpu.memory_space<vmem>>, vector<2x16x32xf32>
    "tpu.trace_start"() <{level = 10 : i32, message = "bqk,bkd->bqd"}> : () -> ()
    %cst_23 = arith.constant dense<0.000000e+00> : vector<2x1x32xf32>
    %29 = tpu.matmul %26, %28, %cst_23 {dimension_numbers = #tpu.dot_dimension_numbers<[2], [1], [1], [2], [0, 0, 0, 1, 1, 2], [0], [0]>} : vector<2x1x16xf32>, vector<2x16x32xf32>, vector<2x1x32xf32> -> vector<2x1x32xf32>
    "tpu.trace_stop"() : () -> ()
    %c0_24 = arith.constant 0 : index
    %c0_25 = arith.constant 0 : index
    %c0_26 = arith.constant 0 : index
    %30 = vector.load %arg7[%c0_24, %c0_25, %c0_26] : memref<2x1x32xf32, #tpu.memory_space<vmem>>, vector<2x1x32xf32>
    tpu.vector_store %arg7[%c0_24, %c0_25, %c0_26], %29 {strides = array<i32>} : memref<2x1x32xf32, #tpu.memory_space<vmem>>, vector<2x1x32xf32>,
    return
  }
  func.func @transform_0(%arg0: i32) -> (i32, i32) {
    %c0_i32 = arith.constant 0 : i32
    %c0_i32_0 = arith.constant 0 : i32
    return %arg0, %c0_i32 : i32, i32
  }
  func.func @transform_1(%arg0: i32) -> (i32, i32, i32) {
    %c0_i32 = arith.constant 0 : i32
    %c0_i32_0 = arith.constant 0 : i32
    %c0_i32_1 = arith.constant 0 : i32
    return %arg0, %c0_i32, %c0_i32_0 : i32, i32, i32
  }
  func.func @transform_2(%arg0: i32) -> (i32, i32, i32) {
    %c0_i32 = arith.constant 0 : i32
    %c0_i32_0 = arith.constant 0 : i32
    %c0_i32_1 = arith.constant 0 : i32
    return %arg0, %c0_i32, %c0_i32_0 : i32, i32, i32
  }
  func.func @transform_3(%arg0: i32) -> (i32, i32, i32) {
    %c0_i32 = arith.constant 0 : i32
    %c0_i32_0 = arith.constant 0 : i32
    %c0_i32_1 = arith.constant 0 : i32
    return %arg0, %c0_i32, %c0_i32_0 : i32, i32, i32
  }
  func.func @transform_4(%arg0: i32) -> (i32, i32) {
    %c0_i32 = arith.constant 0 : i32
    %c0_i32_0 = arith.constant 0 : i32
    %c0_i32_1 = arith.constant 0 : i32
    return %c0_i32, %c0_i32_0 : i32, i32
  }
  func.func @transform_5(%arg0: i32) -> (i32, i32, i32) {
    %c0_i32 = arith.constant 0 : i32
    %c0_i32_0 = arith.constant 0 : i32
    %c0_i32_1 = arith.constant 0 : i32
    %c0_i32_2 = arith.constant 0 : i32
    return %c0_i32, %c0_i32_0, %c0_i32_1 : i32, i32, i32
  }
  func.func @transform_6(%arg0: i32) -> (i32, i32, i32) {
    %c0_i32 = arith.constant 0 : i32
    %c0_i32_0 = arith.constant 0 : i32
    %c0_i32_1 = arith.constant 0 : i32
    return %arg0, %c0_i32, %c0_i32_0 : i32, i32, i32
  }
  func.func @transform_7(%arg0: i32) -> (i32, i32, i32) {
    %c0_i32 = arith.constant 0 : i32
    %c0_i32_0 = arith.constant 0 : i32
    %c0_i32_1 = arith.constant 0 : i32
    return %arg0, %c0_i32, %c0_i32_0 : i32, i32, i32
  }
}

</mosaic_0001>

<bundles_post_ra>
// kernel: single_head_attention.1
= control target key start
LH: loop header
LB: loop body
LE: loop exit
PB: predicated region body
PF: predicated region fallthrough
CT: control target
= control target key end

     0   :  { %13 = vsyncpa [#allocation3], 0  ;;  %s918_s0 = inlined_call_operand.vmem [shape: f32[32,64], index: 0, kind: input, shape index: {}]   ;;  %s919_s1 = inlined_call_operand.hbm [shape: f32[2,16,32], index: 1, kind: input, shape index: {}]   ;;  %s920_s2 = inlined_call_operand.vmem [shape: f32[2,1,64], index: 2, kind: input, shape index: {}]   ;;  %s921_s3 = inlined_call_operand.vmem [shape: f32[2,1,16], index: 3, kind: input, shape index: {}]   ;;  %s922_s4 = inlined_call_operand.vmem [shape: f32[64,64], index: 4, kind: input, shape index: {}]   ;;  %s923_s5 = inlined_call_operand.vmem [shape: f32[1,1,64], index: 5, kind: input, shape index: {}]   ;;  %s924_s6 = inlined_call_operand.hbm [shape: f32[2,1,32], index: 6, kind: output, shape index: {0}]   ;;  %s925_s7 = inlined_call_operand.hbm [shape: f32[2,1,16], index: 7, kind: output, shape index: {1}]  }
   0x1   :  { %14 = vsyncpa [#allocation4], 0 }
   0x2   :  { %15 = vsyncpa [#allocation7], 0  ;;  %s763_s24 = smov [#allocation2]   ;;  %s691_s28 = scalar_lea.hbm %s919_s1, 512 }
   0x3   :  { %s23_s25 = sshll.u32 %s763_s24, 4  ;;  %p692_p0 = scmp.ne.s32.totalorder %s919_s1, %s691_s28  ;;  %s24_s25 = int_to_ptr.vmem [resolvable:$true] %s23_s25 }
   0x4   :  { %p695_p1 = scmp.lt.u32.totalorder %s691_s28, %s919_s1 }
   0x6   :  { %p697_p2 = pnand %p695_p1, %p692_p0 }
   0x8   :  { %700 = shalt.err (!%p697_p2)
}
   0x9   :  { %s701_s10 = scalar_lea.vmem %s24_s25, 512  ;;  %p706_p4 = scmp.lt.s32.totalorder %s24_s25, %s24_s25 }
   0xa   :  { %p702_p3 = scmp.ne.s32.totalorder %s24_s25, %s701_s10  ;;  %p707_p5 = scmp.lt.s32.totalorder %s701_s10, %s701_s10 }
   0xc   :  { %p708_p6 = por %p707_p5, %p706_p4 }
   0xe   :  { %p709_p7 = pnand %p708_p6, %p702_p3 }
  0x10   :  { %712 = shalt.err (!%p709_p7)
}
  0x11   :  { %s764_s11 = smov 128   ;;  %s765_s12 = smov 8  }
  0x12   :  { %29 = dma.hbm_to_vmem [thread:$0]  %s919_s1, 512, %s24_s25, [#allocation3], %s764_s11, %s764_s11, %s765_s12  }
  0x13   :  { %757 = dma.done.wait [#allocation3], 512  }
  0x14   :  { %758 = vsyncadd [#allocation3], 4294966784  ;;  %v45_v0 = vld [vmem:[%s922_s4] sm:$0xff]  ;;  %v46_v1 = vld [vmem:[%s922_s4 + $0x8] sm:$0xff]  ;;  %vm53_vm0 = vcmask 523264   ;;  %v766_v16 = vmov 0.0|0.0  }
  0x15   :  { %v47_v2 = vld [vmem:[%s922_s4 + $0x10] sm:$0xff]  ;;  %v635_v3 = vpack.c.bf16 %v46_v1, %v45_v0  ;;  %v48_v4 = vld [vmem:[%s922_s4 + $0x18] sm:$0xff]  ;;  %v49_v6 = vld [vmem:[%s922_s4 + $0x20] sm:$0xff]  ;;  %651 = vmatprep.subr.bf16.mxu1 %v766_v16  ;;  %vm767_vm1 = vmmov 0   ;;  %v768_v17 = vmov 0.0   ;;  %vm335_vm4 = vcmask 122880  }
  0x16   :  { %v639_v5 = vpack.c.bf16 %v48_v4, %v47_v2  ;;  %v50_v7 = vld [vmem:[%s922_s4 + $0x28] sm:$0xff]  ;;  %v41_v8 = vld [vmem:[%s918_s0] sm:$0xff]  ;;  %v51_v10 = vld [vmem:[%s922_s4 + $0x30] sm:$0xff]  ;;  %611 = vmatprep.mubr.msk.f32.mxu1 %vm767_vm1, %v768_v17  ;;  %vm364_vm6 = vcmask 130048  }
  0x17   :  { %636 = vmatprep.subr.bf16.mxu0 %v635_v3  ;;  %601 = vmatprep.mubr.msk.f32.mxu0 %vm53_vm0, %v41_v8  ;;  %v643_v9 = vpack.c.bf16 %v50_v7, %v49_v6  ;;  %v52_v11 = vld [vmem:[%s922_s4 + $0x38] sm:$0xff]  ;;  %v42_v13 = vld [vmem:[%s918_s0 + $0x8] sm:$0xff]  ;;  %v43_v14 = vld [vmem:[%s918_s0 + $0x10] sm:$0xff] }
  0x18   :  { %638 = vmatpush3.bf16.msra.mxu0 %v635_v3  ;;  %v647_v12 = vpack.c.bf16 %v52_v11, %v51_v10  ;;  %v44_v15 = vld [vmem:[%s918_s0 + $0x18] sm:$0xff]  ;;  %v551_v18 = vld [vmem:[%s920_s2] ss:$0 sm:$0xff]  ;;  %v552_v23 = vld [vmem:[%s920_s2 + $0x1] ss:$0 sm:$0xff] }
  0x19   :  { %640 = vmatprep.subr.bf16.mxu0 %v639_v5  ;;  %vm653_vm2 = vmpackc.low %vm53_vm0, %vm53_vm0  ;;  %v173_v34 = vld [vmem:[%s923_s5] sm:$0x1]  ;;  %v330_v40 = vld [vmem:[%s921_s3 + $0x1] sm:$0x1] }
  0x1a   :  { %v329_v35 = vld [vmem:[%s921_s3] sm:$0x1]  ;;  %vm332_vm5 = vcmp.eq.f32.partialorder %v330_v40, 0.0  ;;  %v361_v56 = vld [vmem:[#allocation2 + $0x8] sm:$0xff]  ;;  %v362_v58 = vld [vmem:[#allocation2 + $0x10] sm:$0xff]  ;;  %s769_s3 = smov [#allocation6]  }
  0x1b   :  { %vm331_vm3 = vcmp.eq.f32.partialorder %v329_v35, 0.0  ;;  %v360_v55 = vld [vmem:[#allocation2] sm:$0xff]  ;;  %v363_v59 = vld [vmem:[#allocation2 + $0x18] sm:$0xff]  ;;  %s531_s21 = sshll.u32 %s769_s3, 4  ;;  %s532_s21 = int_to_ptr.vmem [resolvable:$true] %s531_s21 }
  0x1c   :  { %642 = vmatpush3.bf16.msra.mxu0 %v639_v5  ;;  %v660_v57 = vpack.c.bf16 %v361_v56, %v360_v55  ;;  %v663_v60 = vpack.c.bf16 %v363_v59, %v362_v58  ;;  %s713_s22 = scalar_lea.vmem %s532_s21, 32  ;;  %p718_p9 = scmp.lt.s32.totalorder %s532_s21, %s532_s21 }
  0x1d   :  { %644 = vmatprep.subr.bf16.mxu0 %v643_v9  ;;  %p714_p8 = scmp.ne.s32.totalorder %s532_s21, %s713_s22  ;;  %p719_p10 = scmp.lt.s32.totalorder %s713_s22, %s713_s22 }
  0x1f   :  { %p720_p11 = por %p719_p10, %p718_p9 }
  0x20   :  { %646 = vmatpush3.bf16.msra.mxu0 %v643_v9 }
  0x21   :  { %648 = vmatprep.subr.bf16.mxu0 %v647_v12  ;;  %p721_p12 = pnand %p720_p11, %p714_p8 }
  0x24   :  { %650 = vmatpush3.bf16.msra.mxu0 %v647_v12 }
  0x25   :  { %662 = vmatprep.subr.bf16.mxu0 %v766_v16 }
  0x27   :  { %602 = vmatmul.mubr.msk.f32.vlgmr.msra.gmra.mrb[0].mxu0 %vm53_vm0, %v42_v13 }
  0x28   :  { %604 = vmatprep.mubr.msk.f32.mxu0 %vm53_vm0, %v43_v14  ;;  %664 = vmatpush3.bf16.msra.mxu0 %v663_v60 }
  0x2b   :  { %605 = vmatmul.mubr.msk.f32.gmra.mrb[2].mxu0 %vm53_vm0, %v44_v15 }
  0x2c   :  { %632 = vmatprep.mubr.msk.f32.mxu0 %vm767_vm1, %v768_v17 }
  0xfa   :  { %v603_v19 = vpop.f32.mrb[0].mxu0 }
  0xfb   :  { %v166_v20 = vadd.f32 %v603_v19, %v551_v18  ;;  %v132_v21 = vpop.f32.mrb[1].mxu0 }
  0xfc   :  { %v165_v22 = vadd.f32 %v551_v18, %v132_v21 }
  0xfd   :  { %675 = vtanh.f32 %v166_v20 }
  0xfe   :  { %677 = vtanh.f32 %v165_v22  ;;  %v606_v24 = vpop.f32.mrb[2].mxu0 }
  0xff   :  { %v168_v25 = vadd.f32 %v606_v24, %v552_v23  ;;  %v142_v26 = vpop.f32.mrb[3].mxu0 }
 0x100   :  { %v167_v27 = vadd.f32 %v552_v23, %v142_v26 }
 0x101   :  { %679 = vtanh.f32 %v168_v25 }
 0x102   :  { %681 = vtanh.f32 %v167_v27 }
 0x107   :  { %v676_v28 = vpop.eup %675 }
 0x108   :  { %v678_v29 = vpop.eup %677 }
 0x109   :  { %v652_v30 = vpack.c.bf16 %v676_v28, %v678_v29 }
 0x10b   :  { %v680_v31 = vpop.eup %679  ;;  %654 = vmatpush3.bf16.xpose.msk.msra.mxu1 %vm653_vm2, %v652_v30 }
 0x10c   :  { %v682_v32 = vpop.eup %681  ;;  %655 = vmatprep.subr.bf16.mxu1 %v766_v16 }
 0x10d   :  { %v656_v33 = vpack.c.bf16 %v680_v31, %v682_v32 }
 0x112   :  { %612 = vmatmul.mubr.msk.f32.vlgmr.msra.gmra.mrb[0].mxu1 %vm53_vm0, %v173_v34 }
 0x113   :  { %658 = vmatpush3.bf16.xpose.msk.msra.mxu1 %vm653_vm2, %v656_v33  ;;  %618 = vmatprep.mubr.msk.f32.mxu1 %vm767_vm1, %v768_v17 }
 0x114   :  { %659 = vmatprep.subr.bf16.mxu1 %v766_v16 }
 0x11a   :  { %619 = vmatmul.mubr.msk.f32.vlgmr.msra.gmra.mrb[2].mxu1 %vm53_vm0, %v173_v34 }
 0x11b   :  { %625 = vmatprep.mubr.msk.f32.mxu1 %vm767_vm1, %v768_v17  ;;  %661 = vmatpush3.bf16.msra.mxu1 %v660_v57 }
 0x1e5   :  { %v249_v36 = vpop.f32.mrb[0].mxu1 }
 0x1e6   :  { %v333_v37 = vsel %vm331_vm3, -3.4028235e+38, %v249_v36  ;;  %v613_v38 = vpop.f32.mrb[1].mxu1 }
 0x1e7   :  { %v336_v39 = vsel %vm335_vm4, %v333_v37, -inf }
 0x1e8   :  { %337 = vmax.xlane.f32.xlu0 %v336_v39 }
 0x1ed   :  { %v325_v41 = vpop.f32.mrb[2].mxu1 }
 0x1ee   :  { %v334_v42 = vsel %vm332_vm5, -3.4028235e+38, %v325_v41  ;;  %v620_v43 = vpop.f32.mrb[3].mxu1 }
 0x1ef   :  { %v339_v44 = vsel %vm335_vm4, %v334_v42, -inf }
 0x1f0   :  { %340 = vmax.xlane.f32.xlu0 %v339_v44 }
 0x275   :  { %v338_v45 = vpop.xlane.xlu0 %337 }
 0x276   :  { %v342_v46 = vsub.f32 %v333_v37, %v338_v45 }
 0x278   :  { %v344_v47 = vmul.f32 1.442695, %v342_v46 }
 0x27a   :  { %683 = vpow2.f32 %v344_v47 }
 0x27d   :  { %v341_v48 = vpop.xlane.xlu0 %340 }
 0x27e   :  { %v343_v49 = vsub.f32 %v334_v42, %v341_v48 }
 0x280   :  { %v346_v50 = vmul.f32 1.442695, %v343_v49 }
 0x282   :  { %685 = vpow2.f32 %v346_v50 }
 0x284   :  { %v684_v51 = vpop.eup %683 }
 0x285   :  { %v348_v52 = vsel %vm335_vm4, %v684_v51, 0.0 }
 0x286   :  { %349 = vadd.xlane.f32.xlu1 %v348_v52 }
 0x28c   :  { %v686_v53 = vpop.eup %685 }
 0x28d   :  { %v351_v54 = vsel %vm335_vm4, %v686_v53, 0.0 }
 0x28e   :  { %352 = vadd.xlane.f32.xlu1 %v351_v54 }
 0x313   :  { %v350_v61 = vpop.xlane.xlu1 %349 }
 0x314   :  { %687 = vrcp.f32 %v350_v61 }
 0x31b   :  { %v353_v62 = vpop.xlane.xlu1 %352 }
 0x31c   :  { %689 = vrcp.f32 %v353_v62 }
 0x31e   :  { %v688_v63 = vpop.eup %687 }
 0x31f   :  { %v356_v0 = vmul.f32 %v688_v63, %v684_v51 }
 0x321   :  { %358 = vst.msk [vmem:[#allocation6] sm:$0x1] %vm335_vm4, %v356_v0  ;;  %626 = vmatmul.mubr.msk.f32.vlgmr.msra.gmra.mrb[4].mxu1 %vm364_vm6, %v356_v0 }
 0x326   :  { %v690_v1 = vpop.eup %689 }
 0x327   :  { %v357_v2 = vmul.f32 %v690_v1, %v686_v53 }
 0x329   :  { %359 = vst.msk [vmem:[#allocation6 + $0x1] sm:$0x1] %vm335_vm4, %v357_v2  ;;  %633 = vmatmul.mubr.msk.f32.vlgmr.msra.gmra.mrb[4].mxu0 %vm364_vm6, %v357_v2 }
 0x32a   :  { %724 = shalt.err (!%p721_p12)
}
 0x32b   :  { %s725_s24 = scalar_lea.hbm %s925_s7, 32 }
 0x32c   :  { %p726_p13 = scmp.ne.s32.totalorder %s925_s7, %s725_s24  ;;  %p729_p0 = scmp.lt.u32.totalorder %s725_s24, %s925_s7 }
 0x32e   :  { %p731_p1 = pnand %p729_p0, %p726_p13 }
 0x330   :  { %734 = shalt.err (!%p731_p1)
}
 0x331   :  { %s770_s29 = smov 16   ;;  %s771_s30 = smov 1   ;;  %vm511_vm7 = vcmask 253952  }
 0x332   :  { %537 = dma.vmem_to_hbm [thread:$0]  %s532_s21, 32, %s925_s7, [#allocation7], %s770_s29, %s770_s29, %s771_s30  }
 0x333   :  { %s772_s10 = smov [#allocation5]  }
 0x334   :  { %s519_s11 = sshll.u32 %s772_s10, 4  ;;  %s520_s11 = int_to_ptr.vmem [resolvable:$true] %s519_s11 }
 0x335   :  { %s735_s12 = scalar_lea.vmem %s520_s11, 32  ;;  %p740_p3 = scmp.lt.s32.totalorder %s520_s11, %s520_s11 }
 0x336   :  { %p736_p2 = scmp.ne.s32.totalorder %s520_s11, %s735_s12  ;;  %p741_p4 = scmp.lt.s32.totalorder %s735_s12, %s735_s12 }
 0x338   :  { %p742_p5 = por %p741_p4, %p740_p3 }
 0x33a   :  { %p743_p6 = pnand %p742_p5, %p736_p2 }
 0x3f4   :  { %v434_v3 = vpop.f32.mrb[4].mxu1 }
 0x3f5   :  { %512 = vst.msk [vmem:[#allocation5] sm:$0x1] %vm511_vm7, %v434_v3  ;;  %v627_v4 = vpop.f32.mrb[5].mxu1 }
 0x3fc   :  { %v507_v5 = vpop.f32.mrb[4].mxu0 }
 0x3fd   :  { %513 = vst.msk [vmem:[#allocation5 + $0x1] sm:$0x1] %vm511_vm7, %v507_v5  ;;  %v634_v6 = vpop.f32.mrb[5].mxu0 }
 0x3fe   :  { %746 = shalt.err (!%p743_p6)
}
 0x3ff   :  { %s747_s7 = scalar_lea.hbm %s924_s6, 32 }
 0x400   :  { %p748_p7 = scmp.ne.s32.totalorder %s924_s6, %s747_s7  ;;  %p751_p8 = scmp.lt.u32.totalorder %s747_s7, %s924_s6 }
 0x402   :  { %p753_p9 = pnand %p751_p8, %p748_p7 }
 0x404   :  { %756 = shalt.err (!%p753_p9)
}
 0x405   :  { %525 = dma.vmem_to_hbm [thread:$0]  %s520_s11, 32, %s924_s6, [#allocation4], %s770_s29, %s770_s29, %s771_s30  }
 0x406   :  { %759 = dma.done.wait [#allocation4], 32  }
 0x407   :  { %760 = vsyncadd [#allocation4], 4294967264 }
 0x408   :  { %761 = dma.done.wait [#allocation7], 32  }
 0x409   :  { %762 = vsyncadd [#allocation7], 4294967264 }
 0x40a   :  { %544 = vsyncpa [#allocation3], 1 }
 0x40b   :  { %545 = vsyncpa [#allocation4], 1 }
 0x40c   :  { %546 = vsyncpa [#allocation7], 1 }

</bundles_post_ra>
